<compile_context>
chip_gen: v6e
topology: v6e:2x2x1
jax: 0.10.0
libtpu: 0.0.40
codegen_flags: <defaults>
</compile_context>

<pallas_src>
import functools

import jax
import jax.numpy as jnp
from jax import lax
from jax.experimental import pallas as pl
from jax.experimental.pallas import tpu as pltpu


def rbf_kernel(xt_ref, cp_ref, cpn_ref, o_ref, *, scale):
    """xt_ref: (D, TB) x^T tile; cp_ref: (K, D); cpn_ref: (K, 1); o_ref: (K, TB)."""
    xt = xt_ref[...]                                         # (D, TB), f32
    cp = cp_ref[...]                                         # (K, D),  f32

    # ||x||^2 per batch column (sublane reduce over D).
    xsq = jnp.sum(xt * xt, axis=0, keepdims=True)            # (1, TB)

    # Cross term on the MXU: (K, D) @ (D, TB) -> (K, TB), f32 accumulation.
    cross = jnp.dot(cp, xt,
                    preferred_element_type=jnp.float32,
                    precision=lax.Precision.HIGHEST)

    # Squared-distance expansion; clamp tiny negatives from cancellation.
    sumsq = jnp.maximum(cpn_ref[...] + xsq - 2.0 * cross, 0.0)   # (K, TB)

    # exp runs on the EUP slot; gamma/D are folded into one precomputed scale.
    o_ref[...] = jnp.exp(-scale * sumsq).astype(o_ref.dtype)


def rbf_forward(x, centroids, weight, bias, gamma, *, tile_b=None):
    """x: (B, D); centroids: (K, Cd); weight: (D, Cd) (torch Linear layout); bias: (D,)."""
    B, D = x.shape
    K, Cd = centroids.shape
    assert weight.shape == (D, Cd)
    x = x.astype(jnp.float32)

    # --- Hoisted, grid-invariant centroid projection (tiny; computed once).
    # dot_general contracts centroids' Cd with weight's Cd (no W.T materialized).
    cp = lax.dot_general(
        centroids.astype(jnp.float32), weight.astype(jnp.float32),
        dimension_numbers=(((1,), (1,)), ((), ())),
        preferred_element_type=jnp.float32,
        precision=lax.Precision.HIGHEST) + bias.astype(jnp.float32)[None, :]   # (K, D)
    cp_nsq = jnp.sum(cp * cp, axis=1, keepdims=True)                           # (K, 1)

    # --- Batch tiling: big lane-dense tiles; pad ragged batches.
    # VMEM/step ~ 2 buffers * (D + K) * tile_b * 4B; at tile_b=512 this is far
    # below the 32 MiB scoped default even on v7x (64 MiB physical), so no
    # vmem_limit_bytes override is needed.
    if tile_b is None:
        tile_b = B if B <= 512 else 512
    n_tiles = pl.cdiv(B, tile_b)
    Bp = n_tiles * tile_b

    xT = x.T                                                  # (D, B): batch on lanes
    if Bp != B:
        xT = jnp.pad(xT, ((0, 0), (0, Bp - B)))

    scale = float(gamma) / float(D)

    # NOTE: if K ever grows beyond a few hundred, add a second ("parallel")
    # grid axis over K tiles; with K=3 the full cp stays resident in VMEM.
    out_t = pl.pallas_call(
        functools.partial(rbf_kernel, scale=scale),
        out_shape=jax.ShapeDtypeStruct((K, Bp), jnp.float32),
        grid_spec=pltpu.PrefetchScalarGridSpec(
            num_scalar_prefetch=0,
            grid=(n_tiles,),
            in_specs=[
                pl.BlockSpec((D, tile_b), lambda i: (0, i)),  # x^T tile (streamed)
                pl.BlockSpec((K, D), lambda i: (0, 0)),       # cp (grid-invariant)
                pl.BlockSpec((K, 1), lambda i: (0, 0)),       # ||cp||^2 (invariant)
            ],
            out_specs=pl.BlockSpec((K, tile_b), lambda i: (0, i)),  # lane-dense
        ),
        compiler_params=pltpu.CompilerParams(
            dimension_semantics=("parallel",),   # shards batch tiles on v7x's 2 TCs
        ),
    )(xT, cp, cp_nsq)

    return out_t[:, :B].T                                     # (B, K)


def rbf_reference(x, centroids, weight, bias, gamma):
    cp = centroids @ weight.T + bias                          # (K, D)
    diff = x[:, None, :] - cp[None, :, :]                     # (B, K, D)
    mse = jnp.mean(diff * diff, axis=2)                       # (B, K)
    return jnp.exp(-gamma * mse)


if __name__ == "__main__":
    # Small, deterministic synthetic shapes consistent with the module.
    B = 16          # batch
    D = 16          # input_dim (features of x)
    Cd = 32         # centroid_dim
    K = 3           # n_clusters
    gamma = 4.7665163962213235

    key = jax.random.PRNGKey(0)
    kx, kc, kw, kb = jax.random.split(key, 4)

    x = jax.random.normal(kx, (B, D), dtype=jnp.float32)
    centroids = jax.random.normal(kc, (K, Cd), dtype=jnp.float32)
    # nn.Linear(Cd, D): weight (D, Cd), bias (D,)
    weight = jax.random.normal(kw, (D, Cd), dtype=jnp.float32) * 0.1
    bias = jax.random.normal(kb, (D,), dtype=jnp.float32) * 0.1

    out = jax.block_until_ready(rbf_forward(x, centroids, weight, bias, gamma))
    ref = rbf_reference(x, centroids, weight, bias, gamma)

    assert out.shape == (B, K)
    max_err = jnp.max(jnp.abs(out - ref))
    assert jnp.allclose(out, ref, atol=1e-4, rtol=1e-4), f"mismatch vs reference (max err {max_err})"

    print("KERNEL_OK")
</pallas_src>

<mosaic_0001>
module attributes {stable_mosaic.version = 11 : i64} {
  func.func @rbf_kernel(%arg0: i32, %arg1: memref<16x16xf32, #tpu.memory_space<vmem>>, %arg2: memref<3x16xf32, #tpu.memory_space<vmem>>, %arg3: memref<3x1xf32, #tpu.memory_space<vmem>>, %arg4: memref<3x16xf32, #tpu.memory_space<vmem>>) attributes {dimension_semantics = [#tpu.dimension_semantics<parallel>], iteration_bounds = array<i64: 1>, scalar_prefetch = 0 : i64, scratch_operands = 0 : i64, tpu.core_type = #tpu.core_type<tc>, window_params = [{transform_indices = @transform_0, window_bounds = array<i64: 16, 16>}, {pipeline_mode = #tpu.pipeline_mode<synchronous>, transform_indices = @transform_1, window_bounds = array<i64: 3, 16>}, {pipeline_mode = #tpu.pipeline_mode<synchronous>, transform_indices = @transform_2, window_bounds = array<i64: 3, 1>}, {transform_indices = @transform_3, window_bounds = array<i64: 3, 16>}]} {
    %c0 = arith.constant 0 : index
    %c0_0 = arith.constant 0 : index
    %0 = vector.load %arg1[%c0, %c0_0] : memref<16x16xf32, #tpu.memory_space<vmem>>, vector<16x16xf32>
    %c0_1 = arith.constant 0 : index
    %c0_2 = arith.constant 0 : index
    %1 = vector.load %arg2[%c0_1, %c0_2] : memref<3x16xf32, #tpu.memory_space<vmem>>, vector<3x16xf32>
    %2 = arith.mulf %0, %0 : vector<16x16xf32>
    %cst = arith.constant dense<0.000000e+00> : vector<16xf32>
    %3 = vector.multi_reduction <add>, %2, %cst [0] : vector<16x16xf32> to vector<16xf32>
    %4 = vector.shape_cast %3 : vector<16xf32> to vector<1x16xf32>
    %cst_3 = arith.constant dense<0.000000e+00> : vector<3x16xf32>
    %5 = tpu.matmul %1, %0, %cst_3 {dimension_numbers = #tpu.dot_dimension_numbers<[1], [0], [0], [1], [0, 0, 1, 1], [], []>, precision = #tpu.contract_precision<fp32>} : vector<3x16xf32>, vector<16x16xf32>, vector<3x16xf32> -> vector<3x16xf32>
    %c0_4 = arith.constant 0 : index
    %c0_5 = arith.constant 0 : index
    %6 = vector.load %arg3[%c0_4, %c0_5] : memref<3x1xf32, #tpu.memory_space<vmem>>, vector<3x1xf32>
    %7 = vector.broadcast %6 : vector<3x1xf32> to vector<3x16xf32>
    %8 = vector.broadcast %4 : vector<1x16xf32> to vector<3x16xf32>
    %9 = arith.addf %7, %8 : vector<3x16xf32>
    %cst_6 = arith.constant 2.000000e+00 : f32
    %10 = vector.broadcast %cst_6 : f32 to vector<3x16xf32>
    %11 = arith.mulf %10, %5 : vector<3x16xf32>
    %12 = arith.subf %9, %11 : vector<3x16xf32>
    %cst_7 = arith.constant 0.000000e+00 : f32
    %13 = vector.broadcast %cst_7 : f32 to vector<3x16xf32>
    %14 = arith.maximumf %12, %13 : vector<3x16xf32>
    %cst_8 = arith.constant -0.297907263 : f32
    %15 = vector.broadcast %cst_8 : f32 to vector<3x16xf32>
    %16 = arith.mulf %15, %14 : vector<3x16xf32>
    %17 = math.exp %16 : vector<3x16xf32>
    %c0_9 = arith.constant 0 : index
    %c0_10 = arith.constant 0 : index
    %18 = vector.load %arg4[%c0_9, %c0_10] : memref<3x16xf32, #tpu.memory_space<vmem>>, vector<3x16xf32>
    tpu.vector_store %arg4[%c0_9, %c0_10], %17 {strides = array<i32>} : memref<3x16xf32, #tpu.memory_space<vmem>>, vector<3x16xf32>,
    return
  }
  func.func @transform_0(%arg0: i32) -> (i32, i32) {
    %c0_i32 = arith.constant 0 : i32
    %c0_i32_0 = arith.constant 0 : i32
    return %c0_i32, %arg0 : i32, i32
  }
  func.func @transform_1(%arg0: i32) -> (i32, i32) {
    %c0_i32 = arith.constant 0 : i32
    %c0_i32_0 = arith.constant 0 : i32
    %c0_i32_1 = arith.constant 0 : i32
    return %c0_i32, %c0_i32_0 : i32, i32
  }
  func.func @transform_2(%arg0: i32) -> (i32, i32) {
    %c0_i32 = arith.constant 0 : i32
    %c0_i32_0 = arith.constant 0 : i32
    %c0_i32_1 = arith.constant 0 : i32
    return %c0_i32, %c0_i32_0 : i32, i32
  }
  func.func @transform_3(%arg0: i32) -> (i32, i32) {
    %c0_i32 = arith.constant 0 : i32
    %c0_i32_0 = arith.constant 0 : i32
    return %c0_i32, %arg0 : i32, i32
  }
}

</mosaic_0001>

<bundles_post_ra>
// kernel: tpu_custom_call.1
= control target key start
LH: loop header
LB: loop body
LE: loop exit
PB: predicated region body
PF: predicated region fallthrough
CT: control target
= control target key end

     0   :  { %8 = vsyncpa [#allocation3], 0  ;;  %s698_s0 = inlined_call_operand.hbm [shape: f32[16,16], index: 0, kind: input, shape index: {}]   ;;  %s699_s1 = inlined_call_operand.vmem [shape: f32[3,16], index: 1, kind: input, shape index: {}]   ;;  %s700_s2 = inlined_call_operand.vmem [shape: f32[3,1], index: 2, kind: input, shape index: {}]   ;;  %s701_s3 = inlined_call_operand.hbm [shape: f32[3,16], index: 3, kind: output, shape index: {}]  }
   0x1   :  { %9 = vsyncpa [#allocation4], 0  ;;  %s650_s12 = smov [#allocation2]  }
   0x2   :  { %s15_s13 = sshll.u32 %s650_s12, 4  ;;  %s16_s13 = int_to_ptr.vmem [resolvable:$true] %s15_s13 }
   0x3   :  { %s614_s14 = scalar_lea.vmem %s16_s13, 256  ;;  %p619_p1 = scmp.lt.s32.totalorder %s16_s13, %s16_s13 }
   0x4   :  { %p615_p0 = scmp.ne.s32.totalorder %s16_s13, %s614_s14  ;;  %p620_p2 = scmp.lt.s32.totalorder %s614_s14, %s614_s14 }
   0x6   :  { %p621_p3 = por %p620_p2, %p619_p1 }
   0x8   :  { %p622_p4 = pnand %p621_p3, %p615_p0 }
   0xa   :  { %625 = shalt.err (!%p622_p4)
}
   0xb   :  { %s651_s15 = smov 128   ;;  %s652_s16 = smov 8  }
   0xc   :  { %21 = dma.hbm_to_vmem [thread:$0]  %s698_s0, 256, %s16_s13, [#allocation3], %s651_s15, %s651_s15, %s652_s16  }
   0xd   :  { %646 = dma.done.wait [#allocation3], 256  }
   0xe   :  { %647 = vsyncadd [#allocation3], 4294967040  ;;  %v653_v0 = vmov 0.0   ;;  %vm654_vm0 = vmmov 0   ;;  %v655_v1 = vmov 0   ;;  %vm34_vm1 = vcmask 130048  }
   0xf   :  { %554 = vmatprep.subr.mxu0 %v653_v0  ;;  %561 = vmatprep.subr.mxu1 %v653_v0  ;;  %v30_v2 = vld [vmem:[#allocation2 + $0x8] sm:$0xff]  ;;  %v29_v3 = vld [vmem:[#allocation2] sm:$0xff]  ;;  %vm519_vm2 = vcmask 124928  }
  0x10   :  { %558 = vmatprep.mubr.msk.f32.mxu0 %vm654_vm0, %v653_v0  ;;  %565 = vmatprep.mubr.msk.f32.mxu1 %vm654_vm0, %v653_v0  ;;  %v31_v4 = vld [vmem:[%s699_s1] sm:$0x7]  ;;  %v76_v5 = vand.u32 4294901760, %v30_v2  ;;  %v79_v6 = vand.u32 4294901760, %v29_v3  ;;  %v32_v22 = vmul.f32 %v29_v3, %v29_v3  ;;  %v33_v23 = vmul.f32 %v30_v2, %v30_v2  ;;  %s656_s1 = smov [#allocation5]  }
  0x11   :  { %603 = vset.pattern.permute.xlu0 %v655_v1  ;;  %v45_v7 = vsel %vm34_vm1, %v31_v4, 0  ;;  %v506_v8 = vld [vmem:[%s700_s2] sm:$0x7]  ;;  %s527_s2 = sshll.u32 %s656_s1, 4  ;;  %s528_s2 = int_to_ptr.vmem [resolvable:$true] %s527_s2 }
  0x12   :  { %v114_v9 = vand.u32 4294901760, %v45_v7  ;;  %509 = vperm.xlu0 %603, %v506_v8   ;;  %555 = vmatpush3.msra.mxu0 %v76_v5  ;;  %v154_v10 = vsub.f32 %v30_v2, %v76_v5  ;;  %v161_v11 = vsub.f32 %v29_v3, %v79_v6  ;;  %v35_v24 = vsel %vm34_vm1, %v32_v22, 0.0  ;;  %s626_s22 = scalar_lea.vmem %s528_s2, 64  ;;  %p631_p6 = scmp.lt.s32.totalorder %s528_s2, %s528_s2 }
  0x13   :  { %556 = vmatprep.subr.mxu0 %v653_v0  ;;  %v36_v25 = vsel %vm34_vm1, %v33_v23, 0.0  ;;  %p627_p5 = scmp.ne.s32.totalorder %s528_s2, %s626_s22  ;;  %p632_p7 = scmp.lt.s32.totalorder %s626_s22, %s626_s22 }
  0x14   :  { %v115_v12 = vsub.f32 %v45_v7, %v114_v9  ;;  %557 = vmatpush3.msra.mxu0 %v79_v6  ;;  %v155_v13 = vand.u32 4294901760, %v154_v10  ;;  %v162_v14 = vand.u32 4294901760, %v161_v11  ;;  %v37_v26 = vadd.f32 %v36_v25, %v35_v24 }
  0x15   :  { %568 = vmatprep.subr.mxu0 %v653_v0  ;;  %p633_p8 = por %p632_p7, %p631_p6 }
  0x16   :  { %v116_v15 = vand.u32 4294901760, %v115_v12  ;;  %v156_v16 = vsub.f32 %v154_v10, %v155_v13  ;;  %v163_v17 = vsub.f32 %v161_v11, %v162_v14  ;;  %v38_v27 = vrot.slane %v37_v26, 4 }
  0x17   :  { %p634_p9 = pnand %p633_p8, %p627_p5 }
  0x18   :  { %v117_v18 = vsub.f32 %v115_v12, %v116_v15  ;;  %v157_v19 = vand.u32 4294901760, %v156_v16  ;;  %v164_v20 = vand.u32 4294901760, %v163_v17  ;;  %v39_v28 = vadd.f32 %v38_v27, %v37_v26 }
  0x1a   :  { %v118_v21 = vand.u32 4294901760, %v117_v18  ;;  %562 = vmatpush3.msra.mxu1 %v157_v19  ;;  %v40_v29 = vrot.slane %v39_v28, 2 }
  0x1b   :  { %563 = vmatprep.subr.mxu1 %v653_v0 }
  0x1c   :  { %559 = vmatmul.mubr.f32.vlgmr.msra.gmra.mxu0 %v118_v21  ;;  %564 = vmatpush3.msra.mxu1 %v164_v20  ;;  %v41_v33 = vadd.f32 %v40_v29, %v39_v28 }
  0x1d   :  { %569 = vmatpush3.msra.mxu0 %v154_v10  ;;  %566 = vmatmul.mubr.f32.vlgmr.msra.gmra.mxu1 %v114_v9 }
  0x1e   :  { %570 = vmatprep.subr.mxu0 %v653_v0  ;;  %575 = vmatprep.subr.mxu1 %v653_v0  ;;  %v42_v38 = vrot.slane %v41_v33, 1 }
  0x1f   :  { %571 = vmatpush3.msra.mxu0 %v161_v11  ;;  %572 = vmatprep.mubr.msk.f32.mxu0 %vm654_vm0, %v653_v0 }
  0x20   :  { %576 = vmatpush3.msra.mxu1 %v76_v5  ;;  %573 = vmatmul.mubr.f32.vlgmr.msra.gmra.mxu0 %v115_v12  ;;  %v43_v43 = vadd.f32 %v42_v38, %v41_v33 }
  0x21   :  { %577 = vmatprep.subr.mxu1 %v653_v0  ;;  %582 = vmatprep.subr.mxu0 %v653_v0 }
  0x22   :  { %578 = vmatpush3.msra.mxu1 %v79_v6  ;;  %579 = vmatprep.mubr.msk.f32.mxu1 %vm654_vm0, %v653_v0 }
  0x23   :  { %583 = vmatpush3.msra.mxu0 %v155_v13  ;;  %580 = vmatmul.mubr.f32.vlgmr.msra.gmra.mxu1 %v116_v15 }
  0x24   :  { %584 = vmatprep.subr.mxu0 %v653_v0  ;;  %589 = vmatprep.subr.mxu1 %v653_v0 }
  0x25   :  { %585 = vmatpush3.msra.mxu0 %v162_v14  ;;  %586 = vmatprep.mubr.msk.f32.mxu0 %vm654_vm0, %v653_v0 }
  0x26   :  { %590 = vmatpush3.msra.mxu1 %v76_v5  ;;  %587 = vmatmul.mubr.f32.vlgmr.msra.gmra.mxu0 %v114_v9 }
  0x27   :  { %591 = vmatprep.subr.mxu1 %v653_v0  ;;  %593 = vmatprep.mubr.msk.f32.mxu1 %vm654_vm0, %v653_v0 }
  0x28   :  { %592 = vmatpush3.msra.mxu1 %v79_v6 }
  0x29   :  { %594 = vmatmul.mubr.f32.vlgmr.msra.gmra.mxu1 %v114_v9 }
  0x8d   :  { %v510_v45 = vpop.permute.xlu0 %509 }
  0x8e   :  { %v512_v50 = vadd.f32 %v510_v45, %v43_v43 }
  0xdc   :  { %v120_v30 = vpop.f32.mrf.mxu0 }
  0xdd   :  { %v201_v32 = vpop.f32.mrf.mxu1 }
  0xde   :  { %v560_v31 = vpop.f32.mrf.mxu0  ;;  %v202_v34 = vadd.f32 %v201_v32, %v120_v30 }
  0xdf   :  { %v567_v35 = vpop.f32.mrf.mxu1 }
  0xe0   :  { %v277_v36 = vpop.f32.mrf.mxu0 }
  0xe1   :  { %v278_v37 = vadd.f32 %v277_v36, %v202_v34 }
  0xe2   :  { %v574_v39 = vpop.f32.mrf.mxu0 }
  0xe3   :  { %v352_v40 = vpop.f32.mrf.mxu1 }
  0xe4   :  { %v353_v41 = vadd.f32 %v352_v40, %v278_v37 }
  0xe5   :  { %v581_v42 = vpop.f32.mrf.mxu1 }
  0xe6   :  { %v429_v44 = vpop.f32.mrf.mxu0 }
  0xe7   :  { %v430_v46 = vadd.f32 %v429_v44, %v353_v41 }
  0xe8   :  { %v588_v47 = vpop.f32.mrf.mxu0 }
  0xe9   :  { %v502_v48 = vpop.f32.mrf.mxu1 }
  0xea   :  { %v503_v49 = vadd.f32 %v502_v48, %v430_v46 }
  0xeb   :  { %v595_v51 = vpop.f32.mrf.mxu1 }
  0xec   :  { %v513_v52 = vmul.f32 2.0, %v503_v49 }
  0xee   :  { %v514_v53 = vsub.f32 %v512_v50, %v513_v52 }
  0xf0   :  { %v515_v54 = vmax.f32 %v514_v53, 0.0 }
  0xf2   :  { %v516_v55 = vmul.f32 -0.29790726, %v515_v54 }
  0xf4   :  { %v517_v56 = vmul.f32 1.442695, %v516_v55 }
  0xf6   :  { %604 = vpow2.f32 %v517_v56 }
 0x103   :  { %v605_v57 = vpop.eup %604 }
 0x104   :  { %520 = vst.msk [vmem:[#allocation5] sm:$0x7] %vm519_vm2, %v605_v57 }
 0x105   :  { %637 = shalt.err (!%p634_p9)
}
 0x106   :  { %530 = dma.vmem_to_hbm [thread:$0]  %s528_s2, 64, %s701_s3, [#allocation4]  }
 0x107   :  { %648 = dma.done.wait [#allocation4], 64  }
 0x108   :  { %649 = vsyncadd [#allocation4], 4294967232 }
 0x109   :  { %534 = vsyncpa [#allocation3], 1 }
 0x10a   :  { %535 = vsyncpa [#allocation4], 1 }

</bundles_post_ra>
